<compile_context>
chip_gen: v7x
topology: tpu7x:2x2x1
jax: 0.10.0
libtpu: 0.0.40
codegen_flags: <defaults>
</compile_context>

<pallas_src>
import jax
import jax.numpy as jnp
from jax.experimental import pallas as pl
from jax.experimental.pallas import tpu as pltpu

_LANE = 128


def _round_up(x, m):
    return ((x + m - 1) // m) * m


def _make_state_predictor_kernel(n_steps):
    step_size = 1.0 / n_steps

    def kernel(state_ref, action_ref, w1s_ref, w1a_ref, b1_ref,
               w2_ref, b2_ref, w3_ref, b3_ref, out_ref):
        # Activations: (features, B_tile)  -- batch on the lane axis.
        st = state_ref[...].astype(jnp.float32)       # (S, TB)
        act = action_ref[...].astype(jnp.float32)     # (A, TB)

        # Action (and bias) contribution is constant across Euler steps.
        act_term = (jnp.dot(w1a_ref[...], act, preferred_element_type=jnp.float32)
                    + b1_ref[...])                    # (H, TB)

        next_state = st
        # n_steps is a tiny static count (spec: 1) -> unrolled Python loop.
        for _ in range(n_steps):
            h = jnp.dot(w1s_ref[...], next_state,
                        preferred_element_type=jnp.float32) + act_term
            h = jnp.tanh(h)                           # EUP
            h = jnp.tanh(jnp.dot(w2_ref[...], h,
                                 preferred_element_type=jnp.float32) + b2_ref[...])
            delta = jnp.dot(w3_ref[...], h,
                            preferred_element_type=jnp.float32) + b3_ref[...]
            next_state = step_size * delta + next_state

        out_ref[...] = next_state.astype(out_ref.dtype)

    return kernel


def state_predictor_forward(state, action, params, *, batch_tile=512, n_steps=1):
    """state: (B, state_dim), action: (B, action_dim) -> (B, state_dim)."""
    w1s, w1a, b1, w2, b2, w3, b3 = params
    B, state_dim = state.shape
    action_dim = action.shape[-1]
    hidden_dim = w2.shape[0]

    # Lane-dense layout: batch -> lanes.  Pad B up to a multiple of the tile.
    tb = min(batch_tile, _round_up(B, _LANE))
    Bp = _round_up(B, tb)
    grid = (Bp // tb,)

    state_t = jnp.pad(state.T, ((0, 0), (0, Bp - B)))    # (S, Bp)
    action_t = jnp.pad(action.T, ((0, 0), (0, Bp - B)))  # (A, Bp)

    act_spec = lambda d: pl.BlockSpec((d, tb), lambda i: (0, i))
    res_spec = lambda shape: pl.BlockSpec(shape, lambda i: (0, 0))  # resident weights

    param_bytes = sum(int(p.size) * p.dtype.itemsize
                      for p in (w1s, w1a, b1, w2, b2, w3, b3))
    cost = pl.CostEstimate(
        flops=int(2 * Bp * (n_steps * (state_dim * hidden_dim
                                       + hidden_dim * hidden_dim
                                       + hidden_dim * state_dim)
                            + action_dim * hidden_dim)),
        transcendentals=int(2 * hidden_dim * Bp * n_steps),
        bytes_accessed=int(param_bytes
                           + state.dtype.itemsize * Bp * (2 * state_dim + action_dim)),
    )

    out_t = pl.pallas_call(
        _make_state_predictor_kernel(n_steps),
        out_shape=jax.ShapeDtypeStruct((state_dim, Bp), state.dtype),
        grid=grid,
        in_specs=[
            act_spec(state_dim),                 # state  (streamed per tile)
            act_spec(action_dim),                # action (streamed per tile)
            res_spec((hidden_dim, state_dim)),   # w1_state
            res_spec((hidden_dim, action_dim)),  # w1_action
            res_spec((hidden_dim, 1)),           # b1
            res_spec((hidden_dim, hidden_dim)),  # w2
            res_spec((hidden_dim, 1)),           # b2
            res_spec((state_dim, hidden_dim)),   # w3
            res_spec((state_dim, 1)),            # b3
        ],
        out_specs=act_spec(state_dim),
        compiler_params=pltpu.CompilerParams(
            dimension_semantics=("parallel",)),  # 2 TCs on v7x
        cost_estimate=cost,
        input_output_aliases={0: 0},             # reuse state_t buffer for output
    )(state_t, action_t, w1s, w1a, b1, w2, b2, w3, b3)

    return out_t[:, :B].T


def init_params(key, state_dim, action_dim, hidden_dim=64, dtype=jnp.float32):
    """Synthetic init. Weights kept PyTorch-style (out, in); biases (out, 1).
    w1 is split once here into state / action columns (fused concat)."""
    ks = jax.random.split(key, 6)
    in_dim = state_dim + action_dim

    def lin(kw, kb, fan_in, fan_out):
        bound = 1.0 / (fan_in ** 0.5)
        w = jax.random.uniform(kw, (fan_out, fan_in), dtype, -bound, bound)
        b = jax.random.uniform(kb, (fan_out, 1), dtype, -bound, bound)
        return w, b

    w1, b1 = lin(ks[0], ks[1], in_dim, hidden_dim)
    w2, b2 = lin(ks[2], ks[3], hidden_dim, hidden_dim)
    w3, b3 = lin(ks[4], ks[5], hidden_dim, state_dim)
    w1s, w1a = w1[:, :state_dim], w1[:, state_dim:]
    return (w1s, w1a, b1, w2, b2, w3, b3)


def _reference_forward(state, action, params, n_steps=1):
    """Pure-JAX reference mirroring the PyTorch module."""
    w1s, w1a, b1, w2, b2, w3, b3 = params
    step_size = 1.0 / n_steps
    next_state = state
    for _ in range(n_steps):
        h = jnp.tanh(next_state @ w1s.T + action @ w1a.T + b1[:, 0])
        h = jnp.tanh(h @ w2.T + b2[:, 0])
        delta = h @ w3.T + b3[:, 0]
        next_state = step_size * delta + next_state
    return next_state


if __name__ == "__main__":
    key = jax.random.PRNGKey(0)
    k_state, k_action, k_params, k_big = jax.random.split(key, 4)

    # Pendulum-like small shapes: state_dim=3 (cos, sin, theta_dot), action_dim=1.
    B, state_dim, action_dim, hidden_dim = 8, 3, 1, 32
    params = init_params(k_params, state_dim, action_dim, hidden_dim)

    fwd = jax.jit(state_predictor_forward, static_argnames=("batch_tile", "n_steps"))

    # Small-batch check (single tile, padded to one 128-lane tile).
    state = jax.random.normal(k_state, (B, state_dim), jnp.float32)
    action = jax.random.normal(k_action, (B, action_dim), jnp.float32)
    out = jax.block_until_ready(fwd(state, action, params))
    ref = _reference_forward(state, action, params)
    assert out.shape == (B, state_dim)
    assert jnp.allclose(out, ref, atol=1e-5, rtol=1e-5)

    # Larger batch: exercises the multi-tile grid with resident weights.
    kb_s, kb_a = jax.random.split(k_big)
    Bbig = 1024
    state_b = jax.random.normal(kb_s, (Bbig, state_dim), jnp.float32)
    action_b = jax.random.normal(kb_a, (Bbig, action_dim), jnp.float32)
    out_b = jax.block_until_ready(fwd(state_b, action_b, params, batch_tile=256))
    ref_b = _reference_forward(state_b, action_b, params)
    assert out_b.shape == (Bbig, state_dim)
    assert jnp.allclose(out_b, ref_b, atol=1e-5, rtol=1e-5)

    print("KERNEL_OK")
</pallas_src>

<mosaic_0001>
module attributes {stable_mosaic.version = 11 : i64} {
  func.func @kernel(%arg0: i32, %arg1: memref<3x128xf32, #tpu.memory_space<vmem>>, %arg2: memref<1x128xf32, #tpu.memory_space<vmem>>, %arg3: memref<32x3xf32, #tpu.memory_space<vmem>>, %arg4: memref<32x1xf32, #tpu.memory_space<vmem>>, %arg5: memref<32x1xf32, #tpu.memory_space<vmem>>, %arg6: memref<32x32xf32, #tpu.memory_space<vmem>>, %arg7: memref<32x1xf32, #tpu.memory_space<vmem>>, %arg8: memref<3x32xf32, #tpu.memory_space<vmem>>, %arg9: memref<3x1xf32, #tpu.memory_space<vmem>>, %arg10: memref<3x128xf32, #tpu.memory_space<vmem>>) attributes {dimension_semantics = [#tpu.dimension_semantics<parallel>], iteration_bounds = array<i64: 1>, scalar_prefetch = 0 : i64, scratch_operands = 0 : i64, tpu.core_type = #tpu.core_type<tc>, window_params = [{transform_indices = @transform_0, window_bounds = array<i64: 3, 128>}, {transform_indices = @transform_1, window_bounds = array<i64: 1, 128>}, {pipeline_mode = #tpu.pipeline_mode<synchronous>, transform_indices = @transform_2, window_bounds = array<i64: 32, 3>}, {pipeline_mode = #tpu.pipeline_mode<synchronous>, transform_indices = @transform_3, window_bounds = array<i64: 32, 1>}, {pipeline_mode = #tpu.pipeline_mode<synchronous>, transform_indices = @transform_4, window_bounds = array<i64: 32, 1>}, {pipeline_mode = #tpu.pipeline_mode<synchronous>, transform_indices = @transform_5, window_bounds = array<i64: 32, 32>}, {pipeline_mode = #tpu.pipeline_mode<synchronous>, transform_indices = @transform_6, window_bounds = array<i64: 32, 1>}, {pipeline_mode = #tpu.pipeline_mode<synchronous>, transform_indices = @transform_7, window_bounds = array<i64: 3, 32>}, {pipeline_mode = #tpu.pipeline_mode<synchronous>, transform_indices = @transform_8, window_bounds = array<i64: 3, 1>}, {transform_indices = @transform_9, window_bounds = array<i64: 3, 128>}]} {
    %c0 = arith.constant 0 : index
    %c0_0 = arith.constant 0 : index
    %0 = vector.load %arg1[%c0, %c0_0] : memref<3x128xf32, #tpu.memory_space<vmem>>, vector<3x128xf32>
    %c0_1 = arith.constant 0 : index
    %c0_2 = arith.constant 0 : index
    %1 = vector.load %arg2[%c0_1, %c0_2] : memref<1x128xf32, #tpu.memory_space<vmem>>, vector<1x128xf32>
    %c0_3 = arith.constant 0 : index
    %c0_4 = arith.constant 0 : index
    %2 = vector.load %arg4[%c0_3, %c0_4] : memref<32x1xf32, #tpu.memory_space<vmem>>, vector<32x1xf32>
    %cst = arith.constant dense<0.000000e+00> : vector<32x128xf32>
    %3 = tpu.matmul %2, %1, %cst {dimension_numbers = #tpu.dot_dimension_numbers<[1], [0], [0], [1], [0, 0, 1, 1], [], []>} : vector<32x1xf32>, vector<1x128xf32>, vector<32x128xf32> -> vector<32x128xf32>
    %c0_5 = arith.constant 0 : index
    %c0_6 = arith.constant 0 : index
    %4 = vector.load %arg5[%c0_5, %c0_6] : memref<32x1xf32, #tpu.memory_space<vmem>>, vector<32x1xf32>
    %5 = vector.broadcast %4 : vector<32x1xf32> to vector<32x128xf32>
    %6 = arith.addf %3, %5 : vector<32x128xf32>
    %c0_7 = arith.constant 0 : index
    %c0_8 = arith.constant 0 : index
    %7 = vector.load %arg3[%c0_7, %c0_8] : memref<32x3xf32, #tpu.memory_space<vmem>>, vector<32x3xf32>
    %cst_9 = arith.constant dense<0.000000e+00> : vector<32x128xf32>
    %8 = tpu.matmul %7, %0, %cst_9 {dimension_numbers = #tpu.dot_dimension_numbers<[1], [0], [0], [1], [0, 0, 1, 1], [], []>} : vector<32x3xf32>, vector<3x128xf32>, vector<32x128xf32> -> vector<32x128xf32>
    %9 = arith.addf %8, %6 : vector<32x128xf32>
    %10 = math.tanh %9 : vector<32x128xf32>
    %c0_10 = arith.constant 0 : index
    %c0_11 = arith.constant 0 : index
    %11 = vector.load %arg6[%c0_10, %c0_11] : memref<32x32xf32, #tpu.memory_space<vmem>>, vector<32x32xf32>
    %cst_12 = arith.constant dense<0.000000e+00> : vector<32x128xf32>
    %12 = tpu.matmul %11, %10, %cst_12 {dimension_numbers = #tpu.dot_dimension_numbers<[1], [0], [0], [1], [0, 0, 1, 1], [], []>} : vector<32x32xf32>, vector<32x128xf32>, vector<32x128xf32> -> vector<32x128xf32>
    %c0_13 = arith.constant 0 : index
    %c0_14 = arith.constant 0 : index
    %13 = vector.load %arg7[%c0_13, %c0_14] : memref<32x1xf32, #tpu.memory_space<vmem>>, vector<32x1xf32>
    %14 = vector.broadcast %13 : vector<32x1xf32> to vector<32x128xf32>
    %15 = arith.addf %12, %14 : vector<32x128xf32>
    %16 = math.tanh %15 : vector<32x128xf32>
    %c0_15 = arith.constant 0 : index
    %c0_16 = arith.constant 0 : index
    %17 = vector.load %arg8[%c0_15, %c0_16] : memref<3x32xf32, #tpu.memory_space<vmem>>, vector<3x32xf32>
    %cst_17 = arith.constant dense<0.000000e+00> : vector<3x128xf32>
    %18 = tpu.matmul %17, %16, %cst_17 {dimension_numbers = #tpu.dot_dimension_numbers<[1], [0], [0], [1], [0, 0, 1, 1], [], []>} : vector<3x32xf32>, vector<32x128xf32>, vector<3x128xf32> -> vector<3x128xf32>
    %c0_18 = arith.constant 0 : index
    %c0_19 = arith.constant 0 : index
    %19 = vector.load %arg9[%c0_18, %c0_19] : memref<3x1xf32, #tpu.memory_space<vmem>>, vector<3x1xf32>
    %20 = vector.broadcast %19 : vector<3x1xf32> to vector<3x128xf32>
    %21 = arith.addf %18, %20 : vector<3x128xf32>
    %cst_20 = arith.constant 1.000000e+00 : f32
    %22 = vector.broadcast %cst_20 : f32 to vector<3x128xf32>
    %23 = arith.mulf %22, %21 : vector<3x128xf32>
    %24 = arith.addf %23, %0 : vector<3x128xf32>
    %c0_21 = arith.constant 0 : index
    %c0_22 = arith.constant 0 : index
    %25 = vector.load %arg10[%c0_21, %c0_22] : memref<3x128xf32, #tpu.memory_space<vmem>>, vector<3x128xf32>
    tpu.vector_store %arg10[%c0_21, %c0_22], %24 {strides = array<i32>} : memref<3x128xf32, #tpu.memory_space<vmem>>, vector<3x128xf32>,
    return
  }
  func.func @transform_0(%arg0: i32) -> (i32, i32) {
    %c0_i32 = arith.constant 0 : i32
    %c0_i32_0 = arith.constant 0 : i32
    return %c0_i32, %arg0 : i32, i32
  }
  func.func @transform_1(%arg0: i32) -> (i32, i32) {
    %c0_i32 = arith.constant 0 : i32
    %c0_i32_0 = arith.constant 0 : i32
    return %c0_i32, %arg0 : i32, i32
  }
  func.func @transform_2(%arg0: i32) -> (i32, i32) {
    %c0_i32 = arith.constant 0 : i32
    %c0_i32_0 = arith.constant 0 : i32
    %c0_i32_1 = arith.constant 0 : i32
    return %c0_i32, %c0_i32_0 : i32, i32
  }
  func.func @transform_3(%arg0: i32) -> (i32, i32) {
    %c0_i32 = arith.constant 0 : i32
    %c0_i32_0 = arith.constant 0 : i32
    %c0_i32_1 = arith.constant 0 : i32
    return %c0_i32, %c0_i32_0 : i32, i32
  }
  func.func @transform_4(%arg0: i32) -> (i32, i32) {
    %c0_i32 = arith.constant 0 : i32
    %c0_i32_0 = arith.constant 0 : i32
    %c0_i32_1 = arith.constant 0 : i32
    return %c0_i32, %c0_i32_0 : i32, i32
  }
  func.func @transform_5(%arg0: i32) -> (i32, i32) {
    %c0_i32 = arith.constant 0 : i32
    %c0_i32_0 = arith.constant 0 : i32
    %c0_i32_1 = arith.constant 0 : i32
    return %c0_i32, %c0_i32_0 : i32, i32
  }
  func.func @transform_6(%arg0: i32) -> (i32, i32) {
    %c0_i32 = arith.constant 0 : i32
    %c0_i32_0 = arith.constant 0 : i32
    %c0_i32_1 = arith.constant 0 : i32
    return %c0_i32, %c0_i32_0 : i32, i32
  }
  func.func @transform_7(%arg0: i32) -> (i32, i32) {
    %c0_i32 = arith.constant 0 : i32
    %c0_i32_0 = arith.constant 0 : i32
    %c0_i32_1 = arith.constant 0 : i32
    return %c0_i32, %c0_i32_0 : i32, i32
  }
  func.func @transform_8(%arg0: i32) -> (i32, i32) {
    %c0_i32 = arith.constant 0 : i32
    %c0_i32_0 = arith.constant 0 : i32
    %c0_i32_1 = arith.constant 0 : i32
    return %c0_i32, %c0_i32_0 : i32, i32
  }
  func.func @transform_9(%arg0: i32) -> (i32, i32) {
    %c0_i32 = arith.constant 0 : i32
    %c0_i32_0 = arith.constant 0 : i32
    return %c0_i32, %arg0 : i32, i32
  }
}

</mosaic_0001>

<bundles_post_ra>
// kernel: state_predictor_forward.1
= control target key start
LH: loop header
LB: loop body
LE: loop exit
PB: predicated region body
PF: predicated region fallthrough
CT: control target
= control target key end

     0   :  { %vm75_vm0 = vcmask 1040384   ;;  %vm62_vm1 = vcmask 7168   ;;  %vm181_vm2 = vcmask 1042432   ;;  %v613_v5 = vmov 0   ;;  %s760_s1 = inlined_call_operand.vmem [shape: f32[1,128], index: 1, kind: input, shape index: {}]   ;;  %s761_s3 = inlined_call_operand.vmem [shape: f32[32,1], index: 3, kind: input, shape index: {}]   ;;  %s762_s0 = inlined_call_operand.vmem [shape: f32[3,128], index: 0, kind: input, shape index: {}, may-alias: {0,9}]   ;;  %s763_s4 = inlined_call_operand.vmem [shape: f32[32,1], index: 4, kind: input, shape index: {}]   ;;  %s764_s2 = inlined_call_operand.vmem [shape: f32[32,3], index: 2, kind: input, shape index: {}]   ;;  %s765_s6 = inlined_call_operand.vmem [shape: f32[32,1], index: 6, kind: input, shape index: {}]   ;;  %s766_s8 = inlined_call_operand.vmem [shape: f32[3,1], index: 8, kind: input, shape index: {}]   ;;  %s767_s5 = inlined_call_operand.vmem [shape: f32[32,32], index: 5, kind: input, shape index: {}]   ;;  %s768_s7 = inlined_call_operand.vmem [shape: f32[3,32], index: 7, kind: input, shape index: {}]   ;;  %s769_s9 = inlined_call_operand.vmem [shape: f32[3,128], index: 9, kind: output, shape index: {}, may-alias: {0,9}]  }
   0x1   :  { %v33_v0 = vld [vmem:[%s760_s1] sm:$0x1]  ;;  %v35_v2 = vld [vmem:[%s761_s3 + $0x8] sm:$0xff]  ;;  %v36_v4 = vld [vmem:[%s761_s3 + $0x10] sm:$0xff]  ;;  %595 = vset.pattern.permute.xlu0 %v613_v5  ;;  %vm168_vm3 = vcmask 23552   ;;  %596 = vset.pattern.permute.xlu1 %v613_v5  ;;  %vm302_vm4 = vcmask 261120  }
   0x2   :  { %v34_v1 = vld [vmem:[%s761_s3] sm:$0xff]  ;;  %528 = vmatprep.subr.msk.mxu0 %vm75_vm0, %v33_v0  ;;  %v37_v7 = vld [vmem:[%s761_s3 + $0x18] sm:$0xff]  ;;  %v40_v8 = vld [vmem:[%s763_s4 + $0x10] sm:$0xff]  ;;  %v614_v42 = vmov 0.0|0.0   ;;  %vm615_vm5 = vmmov 0   ;;  %v616_v43 = vmov 0.0  }
   0x3   :  { %530 = vmatprep.mubr.msk.f32.mxu0 %vm62_vm1, %v34_v1  ;;  %v680_v3 = vld [vmem:[%s762_s0] sm:$0x7]  ;;  %529 = vmatpush3.msk.msra.mxu0 %vm75_vm0, %v33_v0  ;;  %v39_v10 = vld [vmem:[%s763_s4 + $0x8] sm:$0xff]  ;;  %v41_v11 = vld [vmem:[%s763_s4 + $0x18] sm:$0xff] }
   0x4   :  { %531 = vmatmul.mubr.msk.f32.vlgmr.msra.gmra.mrb[0].mxu0 %vm62_vm1, %v35_v2  ;;  %536 = vmatprep.subr.msk.mxu0 %vm181_vm2, %v680_v3  ;;  %v38_v6 = vld [vmem:[%s763_s4] sm:$0xff]  ;;  %v165_v12 = vld [vmem:[%s764_s2 + $0x8] sm:$0xff]  ;;  %v166_v13 = vld [vmem:[%s764_s2 + $0x10] sm:$0xff] }
   0x5   :  { %537 = vmatpush3.msk.msra.mxu0 %vm181_vm2, %v680_v3  ;;  %533 = vmatprep.mubr.msk.f32.mxu0 %vm62_vm1, %v36_v4  ;;  %v164_v9 = vld [vmem:[%s764_s2] sm:$0xff]  ;;  %v279_v15 = vld [vmem:[%s765_s6 + $0x8] sm:$0xff]  ;;  %v167_v16 = vld [vmem:[%s764_s2 + $0x18] sm:$0xff] }
   0x6   :  { %44 = vperm.xlu0 %595, %v38_v6   ;;  %54 = vperm.xlu1 %596, %v40_v8   ;;  %v278_v14 = vld [vmem:[%s765_s6] sm:$0xff]  ;;  %v280_v17 = vld [vmem:[%s765_s6 + $0x10] sm:$0xff]  ;;  %v281_v18 = vld [vmem:[%s765_s6 + $0x18] sm:$0xff] }
   0x7   :  { %v405_v19 = vld [vmem:[%s766_s8] sm:$0x7]  ;;  %v275_v39 = vld [vmem:[%s767_s5 + $0x8] sm:$0xff]  ;;  %v276_v40 = vld [vmem:[%s767_s5 + $0x10] sm:$0xff] }
   0x8   :  { %534 = vmatmul.mubr.msk.f32.gmra.mrb[2].mxu0 %vm62_vm1, %v37_v7  ;;  %v274_v20 = vld [vmem:[%s767_s5] sm:$0xff]  ;;  %v277_v41 = vld [vmem:[%s767_s5 + $0x18] sm:$0xff] }
   0x9   :  { %538 = vmatprep.mubr.msk.f32.mxu0 %vm168_vm3, %v164_v9  ;;  %552 = vmatprep.mubr.msk.f32.mxu1 %vm302_vm4, %v274_v20  ;;  %v404_v62 = vld [vmem:[%s768_s7] sm:$0x7] }
   0xa   :  { %49 = vperm.xlu0 %595, %v39_v10   ;;  %59 = vperm.xlu1 %596, %v41_v11  }
   0xc   :  { %539 = vmatmul.mubr.msk.f32.vlgmr.msra.gmra.mrb[0].mxu0 %vm168_vm3, %v165_v12 }
   0xd   :  { %541 = vmatprep.mubr.msk.f32.mxu0 %vm168_vm3, %v166_v13 }
   0xe   :  { %284 = vperm.xlu0 %595, %v278_v14   ;;  %289 = vperm.xlu1 %596, %v279_v15  }
  0x10   :  { %542 = vmatmul.mubr.msk.f32.gmra.mrb[2].mxu0 %vm168_vm3, %v167_v16 }
  0x12   :  { %294 = vperm.xlu0 %595, %v280_v17   ;;  %299 = vperm.xlu1 %596, %v281_v18  }
  0x16   :  { %408 = vperm.xlu0 %595, %v405_v19  }
  0x85   :  { %v45_v21 = vpop.permute.xlu0 %44  ;;  %v55_v22 = vpop.permute.xlu1 %54 }
  0x89   :  { %v50_v23 = vpop.permute.xlu0 %49  ;;  %v60_v28 = vpop.permute.xlu1 %59 }
  0x8d   :  { %v290_v44 = vpop.permute.xlu1 %289  ;;  %v285_v45 = vpop.permute.xlu0 %284 }
  0x91   :  { %v300_v50 = vpop.permute.xlu1 %299  ;;  %v295_v52 = vpop.permute.xlu0 %294 }
  0x95   :  { %v409_v63 = vpop.permute.xlu0 %408 }
  0xdf   :  { %v540_v24 = vpop.f32.mrb[0].mxu0 }
  0xe0   :  { %v583_v25 = vadd.f32 %v540_v24, %v50_v23  ;;  %v251_v26 = vpop.f32.mrb[1].mxu0 }
  0xe1   :  { %v584_v27 = vadd.f32 %v251_v26, %v45_v21 }
  0xe2   :  { %597 = vtanh.f32 %v583_v25 }
  0xe3   :  { %599 = vtanh.f32 %v584_v27  ;;  %v543_v29 = vpop.f32.mrb[2].mxu0 }
  0xe4   :  { %v585_v30 = vadd.f32 %v543_v29, %v60_v28  ;;  %v261_v31 = vpop.f32.mrb[3].mxu0 }
  0xe5   :  { %v586_v32 = vadd.f32 %v261_v31, %v55_v22 }
  0xe6   :  { %601 = vtanh.f32 %v585_v30 }
  0xe7   :  { %603 = vtanh.f32 %v586_v32 }
  0xec   :  { %v598_v33 = vpop.eup %597 }
  0xed   :  { %v600_v34 = vpop.eup %599 }
  0xee   :  { %v569_v35 = vpack.c.bf16 %v598_v33, %v600_v34 }
  0xf0   :  { %v602_v36 = vpop.eup %601  ;;  %570 = vmatprep.subr.bf16.mxu1 %v569_v35 }
  0xf1   :  { %v604_v37 = vpop.eup %603  ;;  %572 = vmatpush3.bf16.msra.mxu1 %v569_v35 }
  0xf2   :  { %v573_v38 = vpack.c.bf16 %v602_v36, %v604_v37 }
  0xf4   :  { %574 = vmatprep.subr.bf16.mxu1 %v573_v38 }
  0xf5   :  { %576 = vmatpush3.bf16.msra.mxu1 %v573_v38 }
  0xf6   :  { %577 = vmatprep.subr.bf16.mxu1 %v614_v42 }
  0xf8   :  { %553 = vmatmul.mubr.msk.f32.vlgmr.msra.gmra.mrb[0].mxu1 %vm302_vm4, %v275_v39 }
  0xf9   :  { %555 = vmatprep.mubr.msk.f32.mxu1 %vm302_vm4, %v276_v40 }
  0xfc   :  { %556 = vmatmul.mubr.msk.f32.gmra.mrb[2].mxu1 %vm302_vm4, %v277_v41 }
  0xfd   :  { %566 = vmatprep.mubr.msk.f32.mxu1 %vm615_vm5, %v616_v43 }
 0x1cb   :  { %v554_v46 = vpop.f32.mrb[0].mxu1 }
 0x1cc   :  { %v387_v47 = vadd.f32 %v554_v46, %v290_v44  ;;  %v381_v48 = vpop.f32.mrb[1].mxu1 }
 0x1cd   :  { %v382_v49 = vadd.f32 %v381_v48, %v285_v45 }
 0x1ce   :  { %605 = vtanh.f32 %v387_v47 }
 0x1cf   :  { %607 = vtanh.f32 %v382_v49  ;;  %v557_v51 = vpop.f32.mrb[2].mxu1 }
 0x1d0   :  { %v397_v53 = vadd.f32 %v557_v51, %v300_v50  ;;  %v391_v54 = vpop.f32.mrb[3].mxu1 }
 0x1d1   :  { %v392_v55 = vadd.f32 %v391_v54, %v295_v52 }
 0x1d2   :  { %609 = vtanh.f32 %v397_v53 }
 0x1d3   :  { %611 = vtanh.f32 %v392_v55 }
 0x1d8   :  { %v606_v56 = vpop.eup %605 }
 0x1d9   :  { %v608_v57 = vpop.eup %607 }
 0x1da   :  { %v578_v58 = vpack.c.bf16 %v606_v56, %v608_v57 }
 0x1dc   :  { %v610_v59 = vpop.eup %609  ;;  %579 = vmatpush3.bf16.msra.mxu1 %v578_v58 }
 0x1dd   :  { %v612_v60 = vpop.eup %611  ;;  %580 = vmatprep.subr.bf16.mxu1 %v614_v42 }
 0x1de   :  { %v581_v61 = vpack.c.bf16 %v610_v59, %v612_v60 }
 0x1e0   :  { %582 = vmatpush3.bf16.msra.mxu1 %v581_v61 }
 0x1e3   :  { %567 = vmatmul.mubr.msk.f32.vlgmr.msra.gmra.mrb[4].mxu1 %vm302_vm4, %v404_v62 }
 0x2b6   :  { %v480_v0 = vpop.f32.mrb[4].mxu1 }
 0x2b7   :  { %v481_v1 = vadd.f32 %v480_v0, %v409_v63  ;;  %v568_v2 = vpop.f32.mrb[5].mxu1 }
 0x2b9   :  { %v484_v4 = vadd.f32 %v481_v1, %v680_v3 }
 0x2bb   :  { %485 = vst [vmem:[%s769_s9] sm:$0x7] %v484_v4 }

</bundles_post_ra>
